<compile_context>
chip_gen: v7x
topology: tpu7x:2x2x1
jax: 0.10.0
libtpu: 0.0.40
codegen_flags: <defaults>
</compile_context>

<pallas_src>
import jax
import jax.numpy as jnp
from jax.experimental import pallas as pl
from jax.experimental.pallas import tpu as pltpu


def _round_up(n, m):
    return ((n + m - 1) // m) * m


def _dqn_mlp_kernel(x_ref, a_ref, w1x_ref, w1a_ref, b1_ref,
                    w2_ref, b2_ref, w3_ref, b3_ref, out_ref):
    # fc1 with the concat fused: cat([x, a]) @ w1 == x @ w1[:S] + a @ w1[S:]
    # bf16 MXU operands, f32 accumulation, f32 bias + ReLU epilogue.
    xb = x_ref[...].astype(jnp.bfloat16)
    ab = a_ref[...].astype(jnp.bfloat16)
    h1 = (jnp.dot(xb, w1x_ref[...], preferred_element_type=jnp.float32)
          + jnp.dot(ab, w1a_ref[...], preferred_element_type=jnp.float32)
          + b1_ref[...])
    h1 = jnp.maximum(h1, 0.0).astype(jnp.bfloat16)                   # ReLU
    h2 = jnp.dot(h1, w2_ref[...], preferred_element_type=jnp.float32) + b2_ref[...]
    h2 = jnp.maximum(h2, 0.0).astype(jnp.bfloat16)                   # ReLU
    out = jnp.dot(h2, w3_ref[...], preferred_element_type=jnp.float32) + b3_ref[...]
    out_ref[...] = out.astype(out_ref.dtype)


def dqn_forward(x, a, params, *, tile_b=1024):
    """Pallas equivalent of DQN.forward(x, a).

    x: (B, state_size) float32 (bf16 also accepted)
    a: (B, n_actions * n_agents) float32 (bf16 also accepted)
    params: dict of w1,b1,w2,b2,w3,b3 with weights as (in, out), biases as (1, out)
    """
    B, state_size = x.shape
    act_size = a.shape[1]
    hidden = params["w1"].shape[1]
    out_dim = params["w3"].shape[1]

    # --- one-time (trace-time) parameter re-layout -------------------------
    # Split w1 so the concat can be fused into the kernel; pad the hidden dim
    # to a lane-dense multiple of 128 (zeros -> exact math); cast to bf16.
    hidden_pad = _round_up(max(hidden, 128), 128)
    w1 = params["w1"].astype(jnp.float32)
    w1x = (jnp.zeros((state_size, hidden_pad), jnp.float32)
           .at[:, :hidden].set(w1[:state_size]).astype(jnp.bfloat16))
    w1a = (jnp.zeros((act_size, hidden_pad), jnp.float32)
           .at[:, :hidden].set(w1[state_size:]).astype(jnp.bfloat16))
    b1p = jnp.zeros((1, hidden_pad), jnp.float32).at[:, :hidden].set(params["b1"])
    w2p = (jnp.zeros((hidden_pad, hidden_pad), jnp.float32)
           .at[:hidden, :hidden].set(params["w2"]).astype(jnp.bfloat16))
    b2p = jnp.zeros((1, hidden_pad), jnp.float32).at[:, :hidden].set(params["b2"])
    w3p = (jnp.zeros((hidden_pad, out_dim), jnp.float32)
           .at[:hidden, :].set(params["w3"]).astype(jnp.bfloat16))
    b3p = params["b3"].astype(jnp.float32).reshape(1, out_dim)

    # --- batch tiling -------------------------------------------------------
    if B <= tile_b:
        tb = _round_up(max(B, 8), 8)      # whole batch in a single block
    else:
        tb = _round_up(tile_b, 256)       # full-height MXU pushes on v6e/v7x
    Bp = _round_up(B, tb)
    if Bp != B:
        x = jnp.pad(x, ((0, Bp - B), (0, 0)))
        a = jnp.pad(a, ((0, Bp - B), (0, 0)))
    grid = (Bp // tb,)

    def act_spec(feat):
        return pl.BlockSpec((tb, feat), lambda i: (i, 0))

    def resident_spec(shape):
        # Same block every grid step -> stays resident in VMEM, fetched once.
        return pl.BlockSpec(shape, lambda i: (0, 0))

    # VMEM budget from the actual footprint (double-buffered I/O + resident
    # weights + f32 hidden intermediates), with headroom; capped at v7x's 64 MiB.
    tile_io_bytes = tb * (state_size * x.dtype.itemsize
                          + act_size * a.dtype.itemsize
                          + out_dim * 4)
    weight_bytes = sum(int(t.size) * t.dtype.itemsize
                       for t in (w1x, w1a, b1p, w2p, b2p, w3p, b3p))
    scratch_bytes = 2 * tb * hidden_pad * 4
    vmem_limit = int(min(max(2 * (tile_io_bytes + weight_bytes) + scratch_bytes
                             + (8 << 20), 16 << 20), 64 << 20))

    out = pl.pallas_call(
        _dqn_mlp_kernel,
        out_shape=jax.ShapeDtypeStruct((Bp, out_dim), jnp.float32),
        grid_spec=pltpu.PrefetchScalarGridSpec(
            num_scalar_prefetch=0,
            grid=grid,
            in_specs=[
                act_spec(state_size),          # x tile
                act_spec(act_size),            # a tile
                resident_spec(w1x.shape),      # w1[:S]  (hidden-padded, bf16)
                resident_spec(w1a.shape),      # w1[S:]  (hidden-padded, bf16)
                resident_spec(b1p.shape),      # b1      (hidden-padded, f32)
                resident_spec(w2p.shape),      # w2      (hidden-padded, bf16)
                resident_spec(b2p.shape),      # b2      (hidden-padded, f32)
                resident_spec(w3p.shape),      # w3      (row-padded, bf16)
                resident_spec(b3p.shape),      # b3      (f32)
            ],
            # Output written at its true width (block last dim == full array
            # dim): masked vst but ~32x fewer store bytes than 128-lane padding,
            # and no wrapper column-slice pass.
            out_specs=pl.BlockSpec((tb, out_dim), lambda i: (i, 0)),
        ),
        compiler_params=pltpu.CompilerParams(
            dimension_semantics=("parallel",),   # shard batch tiles across TCs (v7x)
            vmem_limit_bytes=vmem_limit,
        ),
    )(x, a, w1x, w1a, b1p, w2p, b2p, w3p, b3p)

    # Strip batch padding only when it was added.
    return out if Bp == B else out[:B]


def init_dqn_params(key, state_size, hidden_size, output_size, n_actions, n_agents):
    """Deterministic init mirroring nn.Linear default (uniform +/- 1/sqrt(fan_in))."""
    in1 = state_size + n_actions * n_agents
    dims = [(in1, hidden_size), (hidden_size, hidden_size), (hidden_size, output_size)]
    params = {}
    for i, (fan_in, fan_out) in enumerate(dims, start=1):
        key, kw, kb = jax.random.split(key, 3)
        bound = 1.0 / jnp.sqrt(jnp.float32(fan_in))
        params[f"w{i}"] = jax.random.uniform(
            kw, (fan_in, fan_out), jnp.float32, -bound, bound)
        params[f"b{i}"] = jax.random.uniform(
            kb, (1, fan_out), jnp.float32, -bound, bound)
    return params


if __name__ == "__main__":
    # Small, forward-consistent shapes.
    batch = 2
    state_size = 16
    hidden_size = 32
    output_size = 4
    n_actions = 4
    n_agents = 2

    key = jax.random.PRNGKey(0)
    kp, kx, ka = jax.random.split(key, 3)

    params = init_dqn_params(kp, state_size, hidden_size, output_size,
                             n_actions, n_agents)
    x = jax.random.normal(kx, (batch, state_size), jnp.float32)
    a = jax.random.normal(ka, (batch, n_actions * n_agents), jnp.float32)

    out = dqn_forward(x, a, params)
    jax.block_until_ready(out)

    # Pure-JAX f32 reference of the same math (original concat formulation).
    # Tolerance is loosened vs. the previous version because matmul operands
    # are bf16 (f32 accumulation) inside the kernel.
    ct = jnp.concatenate([x, a], axis=1)
    ref = jnp.maximum(ct @ params["w1"] + params["b1"], 0.0)
    ref = jnp.maximum(ref @ params["w2"] + params["b2"], 0.0)
    ref = ref @ params["w3"] + params["b3"]
    assert out.shape == (batch, output_size)
    assert jnp.allclose(out, ref, atol=5e-2, rtol=5e-2)

    print("KERNEL_OK")
</pallas_src>

<mosaic_0001>
module attributes {stable_mosaic.version = 11 : i64} {
  func.func @_dqn_mlp_kernel(%arg0: i32, %arg1: memref<8x16xf32, #tpu.memory_space<vmem>>, %arg2: memref<8x8xf32, #tpu.memory_space<vmem>>, %arg3: memref<16x128xbf16, #tpu.memory_space<vmem>>, %arg4: memref<8x128xbf16, #tpu.memory_space<vmem>>, %arg5: memref<1x128xf32, #tpu.memory_space<vmem>>, %arg6: memref<128x128xbf16, #tpu.memory_space<vmem>>, %arg7: memref<1x128xf32, #tpu.memory_space<vmem>>, %arg8: memref<128x4xbf16, #tpu.memory_space<vmem>>, %arg9: memref<1x4xf32, #tpu.memory_space<vmem>>, %arg10: memref<8x4xf32, #tpu.memory_space<vmem>>) attributes {dimension_semantics = [#tpu.dimension_semantics<parallel>], iteration_bounds = array<i64: 1>, scalar_prefetch = 0 : i64, scratch_operands = 0 : i64, tpu.core_type = #tpu.core_type<tc>, window_params = [{transform_indices = @transform_0, window_bounds = array<i64: 8, 16>}, {transform_indices = @transform_1, window_bounds = array<i64: 8, 8>}, {pipeline_mode = #tpu.pipeline_mode<synchronous>, transform_indices = @transform_2, window_bounds = array<i64: 16, 128>}, {pipeline_mode = #tpu.pipeline_mode<synchronous>, transform_indices = @transform_3, window_bounds = array<i64: 8, 128>}, {pipeline_mode = #tpu.pipeline_mode<synchronous>, transform_indices = @transform_4, window_bounds = array<i64: 1, 128>}, {pipeline_mode = #tpu.pipeline_mode<synchronous>, transform_indices = @transform_5, window_bounds = array<i64: 128, 128>}, {pipeline_mode = #tpu.pipeline_mode<synchronous>, transform_indices = @transform_6, window_bounds = array<i64: 1, 128>}, {pipeline_mode = #tpu.pipeline_mode<synchronous>, transform_indices = @transform_7, window_bounds = array<i64: 128, 4>}, {pipeline_mode = #tpu.pipeline_mode<synchronous>, transform_indices = @transform_8, window_bounds = array<i64: 1, 4>}, {transform_indices = @transform_9, window_bounds = array<i64: 8, 4>}]} {
    %c0 = arith.constant 0 : index
    %c0_0 = arith.constant 0 : index
    %0 = vector.load %arg1[%c0, %c0_0] : memref<8x16xf32, #tpu.memory_space<vmem>>, vector<8x16xf32>
    %1 = arith.truncf %0 : vector<8x16xf32> to vector<8x16xbf16>
    %c0_1 = arith.constant 0 : index
    %c0_2 = arith.constant 0 : index
    %2 = vector.load %arg2[%c0_1, %c0_2] : memref<8x8xf32, #tpu.memory_space<vmem>>, vector<8x8xf32>
    %3 = arith.truncf %2 : vector<8x8xf32> to vector<8x8xbf16>
    %c0_3 = arith.constant 0 : index
    %c0_4 = arith.constant 0 : index
    %4 = vector.load %arg3[%c0_3, %c0_4] : memref<16x128xbf16, #tpu.memory_space<vmem>>, vector<16x128xbf16>
    %cst = arith.constant dense<0.000000e+00> : vector<8x128xf32>
    %5 = tpu.matmul %1, %4, %cst {dimension_numbers = #tpu.dot_dimension_numbers<[1], [0], [0], [1], [0, 0, 1, 1], [], []>} : vector<8x16xbf16>, vector<16x128xbf16>, vector<8x128xf32> -> vector<8x128xf32>
    %c0_5 = arith.constant 0 : index
    %c0_6 = arith.constant 0 : index
    %6 = vector.load %arg4[%c0_5, %c0_6] : memref<8x128xbf16, #tpu.memory_space<vmem>>, vector<8x128xbf16>
    %cst_7 = arith.constant dense<0.000000e+00> : vector<8x128xf32>
    %7 = tpu.matmul %3, %6, %cst_7 {dimension_numbers = #tpu.dot_dimension_numbers<[1], [0], [0], [1], [0, 0, 1, 1], [], []>} : vector<8x8xbf16>, vector<8x128xbf16>, vector<8x128xf32> -> vector<8x128xf32>
    %8 = arith.addf %5, %7 : vector<8x128xf32>
    %c0_8 = arith.constant 0 : index
    %c0_9 = arith.constant 0 : index
    %9 = vector.load %arg5[%c0_8, %c0_9] : memref<1x128xf32, #tpu.memory_space<vmem>>, vector<1x128xf32>
    %10 = vector.broadcast %9 : vector<1x128xf32> to vector<8x128xf32>
    %11 = arith.addf %8, %10 : vector<8x128xf32>
    %cst_10 = arith.constant 0.000000e+00 : f32
    %12 = vector.broadcast %cst_10 : f32 to vector<8x128xf32>
    %13 = arith.maximumf %11, %12 : vector<8x128xf32>
    %14 = arith.truncf %13 : vector<8x128xf32> to vector<8x128xbf16>
    %c0_11 = arith.constant 0 : index
    %c0_12 = arith.constant 0 : index
    %15 = vector.load %arg6[%c0_11, %c0_12] : memref<128x128xbf16, #tpu.memory_space<vmem>>, vector<128x128xbf16>
    %cst_13 = arith.constant dense<0.000000e+00> : vector<8x128xf32>
    %16 = tpu.matmul %14, %15, %cst_13 {dimension_numbers = #tpu.dot_dimension_numbers<[1], [0], [0], [1], [0, 0, 1, 1], [], []>} : vector<8x128xbf16>, vector<128x128xbf16>, vector<8x128xf32> -> vector<8x128xf32>
    %c0_14 = arith.constant 0 : index
    %c0_15 = arith.constant 0 : index
    %17 = vector.load %arg7[%c0_14, %c0_15] : memref<1x128xf32, #tpu.memory_space<vmem>>, vector<1x128xf32>
    %18 = vector.broadcast %17 : vector<1x128xf32> to vector<8x128xf32>
    %19 = arith.addf %16, %18 : vector<8x128xf32>
    %cst_16 = arith.constant 0.000000e+00 : f32
    %20 = vector.broadcast %cst_16 : f32 to vector<8x128xf32>
    %21 = arith.maximumf %19, %20 : vector<8x128xf32>
    %22 = arith.truncf %21 : vector<8x128xf32> to vector<8x128xbf16>
    %c0_17 = arith.constant 0 : index
    %c0_18 = arith.constant 0 : index
    %23 = vector.load %arg8[%c0_17, %c0_18] : memref<128x4xbf16, #tpu.memory_space<vmem>>, vector<128x4xbf16>
    %cst_19 = arith.constant dense<0.000000e+00> : vector<8x4xf32>
    %24 = tpu.matmul %22, %23, %cst_19 {dimension_numbers = #tpu.dot_dimension_numbers<[1], [0], [0], [1], [0, 0, 1, 1], [], []>} : vector<8x128xbf16>, vector<128x4xbf16>, vector<8x4xf32> -> vector<8x4xf32>
    %c0_20 = arith.constant 0 : index
    %c0_21 = arith.constant 0 : index
    %25 = vector.load %arg9[%c0_20, %c0_21] : memref<1x4xf32, #tpu.memory_space<vmem>>, vector<1x4xf32>
    %26 = vector.broadcast %25 : vector<1x4xf32> to vector<8x4xf32>
    %27 = arith.addf %24, %26 : vector<8x4xf32>
    %c0_22 = arith.constant 0 : index
    %c0_23 = arith.constant 0 : index
    %28 = vector.load %arg10[%c0_22, %c0_23] : memref<8x4xf32, #tpu.memory_space<vmem>>, vector<8x4xf32>
    tpu.vector_store %arg10[%c0_22, %c0_23], %27 {strides = array<i32>} : memref<8x4xf32, #tpu.memory_space<vmem>>, vector<8x4xf32>,
    return
  }
  func.func @transform_0(%arg0: i32) -> (i32, i32) {
    %c0_i32 = arith.constant 0 : i32
    %c0_i32_0 = arith.constant 0 : i32
    return %arg0, %c0_i32 : i32, i32
  }
  func.func @transform_1(%arg0: i32) -> (i32, i32) {
    %c0_i32 = arith.constant 0 : i32
    %c0_i32_0 = arith.constant 0 : i32
    return %arg0, %c0_i32 : i32, i32
  }
  func.func @transform_2(%arg0: i32) -> (i32, i32) {
    %c0_i32 = arith.constant 0 : i32
    %c0_i32_0 = arith.constant 0 : i32
    %c0_i32_1 = arith.constant 0 : i32
    return %c0_i32, %c0_i32_0 : i32, i32
  }
  func.func @transform_3(%arg0: i32) -> (i32, i32) {
    %c0_i32 = arith.constant 0 : i32
    %c0_i32_0 = arith.constant 0 : i32
    %c0_i32_1 = arith.constant 0 : i32
    return %c0_i32, %c0_i32_0 : i32, i32
  }
  func.func @transform_4(%arg0: i32) -> (i32, i32) {
    %c0_i32 = arith.constant 0 : i32
    %c0_i32_0 = arith.constant 0 : i32
    %c0_i32_1 = arith.constant 0 : i32
    return %c0_i32, %c0_i32_0 : i32, i32
  }
  func.func @transform_5(%arg0: i32) -> (i32, i32) {
    %c0_i32 = arith.constant 0 : i32
    %c0_i32_0 = arith.constant 0 : i32
    %c0_i32_1 = arith.constant 0 : i32
    return %c0_i32, %c0_i32_0 : i32, i32
  }
  func.func @transform_6(%arg0: i32) -> (i32, i32) {
    %c0_i32 = arith.constant 0 : i32
    %c0_i32_0 = arith.constant 0 : i32
    %c0_i32_1 = arith.constant 0 : i32
    return %c0_i32, %c0_i32_0 : i32, i32
  }
  func.func @transform_7(%arg0: i32) -> (i32, i32) {
    %c0_i32 = arith.constant 0 : i32
    %c0_i32_0 = arith.constant 0 : i32
    %c0_i32_1 = arith.constant 0 : i32
    return %c0_i32, %c0_i32_0 : i32, i32
  }
  func.func @transform_8(%arg0: i32) -> (i32, i32) {
    %c0_i32 = arith.constant 0 : i32
    %c0_i32_0 = arith.constant 0 : i32
    %c0_i32_1 = arith.constant 0 : i32
    return %c0_i32, %c0_i32_0 : i32, i32
  }
  func.func @transform_9(%arg0: i32) -> (i32, i32) {
    %c0_i32 = arith.constant 0 : i32
    %c0_i32_0 = arith.constant 0 : i32
    return %arg0, %c0_i32 : i32, i32
  }
}

</mosaic_0001>

<bundles_post_ra>
// kernel: tpu_custom_call.1
= control target key start
LH: loop header
LB: loop body
LE: loop exit
PB: predicated region body
PF: predicated region fallthrough
CT: control target
= control target key end

     0   :  { %14 = vsyncpa [#allocation3], 0  ;;  %s745_s0 = inlined_call_operand.vmem [shape: f32[8,16], index: 0, kind: input, shape index: {}]   ;;  %s746_s1 = inlined_call_operand.vmem [shape: f32[8,8], index: 1, kind: input, shape index: {}]   ;;  %s747_s2 = inlined_call_operand.hbm [shape: bf16[16,128], index: 2, kind: input, shape index: {}]   ;;  %s748_s3 = inlined_call_operand.vmem [shape: bf16[8,128], index: 3, kind: input, shape index: {}]   ;;  %s749_s4 = inlined_call_operand.hbm [shape: f32[1,128], index: 4, kind: input, shape index: {}]   ;;  %s750_s5 = inlined_call_operand.vmem [shape: bf16[128,128], index: 5, kind: input, shape index: {}]   ;;  %s751_s6 = inlined_call_operand.vmem [shape: f32[1,128], index: 6, kind: input, shape index: {}]   ;;  %s752_s7 = inlined_call_operand.vmem [shape: bf16[128,4], index: 7, kind: input, shape index: {}]   ;;  %s753_s8 = inlined_call_operand.vmem [shape: f32[1,4], index: 8, kind: input, shape index: {}]   ;;  %s754_s9 = inlined_call_operand.vmem [shape: f32[8,4], index: 9, kind: output, shape index: {}]  }
   0x1   :  { %15 = vsyncpa [#allocation5], 0  ;;  %s573_s30 = smov [#allocation2]   ;;  %s525_s13 = scalar_lea.hbm %s747_s2, 128 }
   0x2   :  { %s25_s10 = sshll.u32 %s573_s30, 4  ;;  %p526_p0 = scmp.ne.s32.totalorder %s747_s2, %s525_s13  ;;  %s26_s10 = int_to_ptr.vmem [resolvable:$true] %s25_s10 }
   0x3   :  { %p529_p1 = scmp.lt.u32.totalorder %s525_s13, %s747_s2 }
   0x5   :  { %p531_p2 = pnand %p529_p1, %p526_p0 }
   0x7   :  { %534 = shalt.err (!%p531_p2)
}
   0x8   :  { %s535_s18 = scalar_lea.vmem %s26_s10, 128  ;;  %p540_p4 = scmp.lt.s32.totalorder %s26_s10, %s26_s10 }
   0x9   :  { %p536_p3 = scmp.ne.s32.totalorder %s26_s10, %s535_s18  ;;  %p541_p5 = scmp.lt.s32.totalorder %s535_s18, %s535_s18 }
   0xb   :  { %p542_p6 = por %p541_p5, %p540_p4 }
   0xd   :  { %p543_p7 = pnand %p542_p6, %p536_p3 }
   0xf   :  { %546 = shalt.err (!%p543_p7)
}
  0x10   :  { %s574_s19 = smov 64   ;;  %s575_s20 = smov 4  }
  0x11   :  { %31 = dma.hbm_to_vmem [thread:$0]  %s747_s2, 128, %s26_s10, [#allocation3], %s574_s19, %s574_s19, %s575_s20  }
  0x12   :  { %s576_s23 = smov [#allocation4]   ;;  %s547_s27 = scalar_lea.hbm %s749_s4, 16 }
  0x13   :  { %s40_s24 = sshll.u32 %s576_s23, 4  ;;  %p548_p8 = scmp.ne.s32.totalorder %s749_s4, %s547_s27  ;;  %s41_s24 = int_to_ptr.vmem [resolvable:$true] %s40_s24 }
  0x14   :  { %p551_p9 = scmp.lt.u32.totalorder %s547_s27, %s749_s4 }
  0x16   :  { %p553_p10 = pnand %p551_p9, %p548_p8 }
  0x18   :  { %556 = shalt.err (!%p553_p10)
}
  0x19   :  { %s557_s12 = scalar_lea.vmem %s41_s24, 16  ;;  %s561_s2 = scalar_lea.vmem %s41_s24, 32 }
  0x1a   :  { %p558_p11 = scmp.ne.s32.totalorder %s41_s24, %s557_s12  ;;  %p562_p12 = scmp.lt.s32.totalorder %s41_s24, %s41_s24 }
  0x1b   :  { %p563_p13 = scmp.lt.s32.totalorder %s561_s2, %s557_s12 }
  0x1d   :  { %p564_p0 = por %p563_p13, %p562_p12 }
  0x1f   :  { %p565_p1 = pnand %p564_p0, %p558_p11 }
  0x21   :  { %568 = shalt.err (!%p565_p1)
}
  0x22   :  { %43 = dma.hbm_to_vmem [thread:$0]  %s749_s4, 16, %s41_s24, [#allocation5]  }
  0x23   :  { %569 = dma.done.wait [#allocation3], 128  }
  0x24   :  { %570 = vsyncadd [#allocation3], 4294967168 }
  0x25   :  { %571 = dma.done.wait [#allocation5], 16  }
  0x26   :  { %572 = vsyncadd [#allocation5], 4294967280  ;;  %v577_v0 = vmov 0.0   ;;  %vm578_vm0 = vmmov 0   ;;  %vm70_vm1 = vcmask 1043456   ;;  %v508_v3 = vld [vmem:[#allocation2] sm:$0xff]  }
  0x27   :  { %450 = vmatprep.subr.bf16.mxu0 %v577_v0  ;;  %456 = vmatprep.subr.bf16.mxu1 %v577_v0  ;;  %v65_v1 = vld [vmem:[%s748_s3] sm:$0xf]  ;;  %vm66_vm2 = vcmask 64512   ;;  %vm120_vm3 = vcmask 130048   ;;  %v510_v9 = vld [vmem:[%s750_s5 + $0x8] sm:$0xff]   ;;  %v511_v10 = vld [vmem:[%s750_s5 + $0x10] sm:$0xff]  }
  0x28   :  { %452 = vmatprep.mubr.msk.bf16.mxu0 %vm578_vm0, %v577_v0  ;;  %458 = vmatprep.mubr.msk.bf16.mxu1 %vm578_vm0, %v577_v0  ;;  %v72_v2 = vsel %vm70_vm1, %v65_v1, 0  ;;  %v61_v4 = vld [vmem:[%s746_s1] sm:$0xff]  ;;  %v512_v11 = vld [vmem:[%s750_s5 + $0x18] sm:$0xff]   ;;  %v514_v13 = vld [vmem:[%s750_s5 + $0x28] sm:$0xff]   ;;  %vm398_vm4 = vcmask 31744  }
  0x29   :  { %v59_v5 = vld [vmem:[%s745_s0] sm:$0xff]  ;;  %451 = vmatpush3.bf16.msra.mxu0 %v72_v2  ;;  %v62_v6 = vpack.c.bf16 %v61_v4, %v61_v4  ;;  %457 = vmatpush3.bf16.msra.mxu1 %v508_v3  ;;  %v515_v14 = vld [vmem:[%s750_s5 + $0x30] sm:$0xff]   ;;  %v516_v15 = vld [vmem:[%s750_s5 + $0x38] sm:$0xff]  }
  0x2a   :  { %v60_v7 = vpack.c.bf16 %v59_v5, %v59_v5  ;;  %v509_v8 = vld [vmem:[%s750_s5] sm:$0xff]   ;;  %462 = vmatprep.subr.bf16.mxu0 %v577_v0  ;;  %482 = vmatprep.subr.bf16.mxu1 %v577_v0  ;;  %v518_v17 = vld [vmem:[%s752_s7 + $0x8] sm:$0xff]   ;;  %v519_v18 = vld [vmem:[%s752_s7 + $0x10] sm:$0xff]  }
  0x2b   :  { %v513_v12 = vld [vmem:[%s750_s5 + $0x20] sm:$0xff]   ;;  %v520_v19 = vld [vmem:[%s752_s7 + $0x18] sm:$0xff]   ;;  %v522_v21 = vld [vmem:[%s752_s7 + $0x28] sm:$0xff]  }
  0x2c   :  { %453 = vmatmul.mubr.msk.bf16.vlgmr.msra.gmra.mrb[0].mxu0 %vm66_vm2, %v62_v6  ;;  %459 = vmatmul.mubr.msk.bf16.vlgmr.msra.gmra.mrb[0].mxu1 %vm120_vm3, %v60_v7  ;;  %v517_v16 = vld [vmem:[%s752_s7] sm:$0xff]   ;;  %v409_v25 = vld [vmem:[#allocation4] ss:$0 sm:$0xff]  ;;  %v523_v35 = vld [vmem:[%s752_s7 + $0x30] sm:$0xff]  }
  0x2d   :  { %463 = vmatpush3.bf16.msra.mxu0 %v509_v8  ;;  %478 = vmatprep.mubr.msk.bf16.mxu0 %vm578_vm0, %v577_v0  ;;  %v521_v20 = vld [vmem:[%s752_s7 + $0x20] sm:$0xff]   ;;  %v524_v36 = vld [vmem:[%s752_s7 + $0x38] sm:$0xff]  }
  0x2e   :  { %464 = vmatprep.subr.bf16.mxu0 %v577_v0  ;;  %498 = vmatprep.mubr.msk.bf16.mxu1 %vm578_vm0, %v577_v0  ;;  %v410_v37 = vld [vmem:[%s751_s6] ss:$0 sm:$0xff] }
  0x2f   :  { %483 = vmatpush3.bf16.msra.mxu1 %v517_v16  ;;  %v419_v45 = vld [vmem:[%s753_s8] ss:$0 sm:$0xff] }
  0x30   :  { %484 = vmatprep.subr.bf16.mxu1 %v577_v0 }
  0x31   :  { %465 = vmatpush3.bf16.msra.mxu0 %v510_v9 }
  0x32   :  { %466 = vmatprep.subr.bf16.mxu0 %v577_v0 }
  0x33   :  { %485 = vmatpush3.bf16.msra.mxu1 %v518_v17 }
  0x34   :  { %486 = vmatprep.subr.bf16.mxu1 %v577_v0 }
  0x35   :  { %467 = vmatpush3.bf16.msra.mxu0 %v511_v10 }
  0x36   :  { %468 = vmatprep.subr.bf16.mxu0 %v577_v0 }
  0x37   :  { %487 = vmatpush3.bf16.msra.mxu1 %v519_v18 }
  0x38   :  { %488 = vmatprep.subr.bf16.mxu1 %v577_v0 }
  0x39   :  { %469 = vmatpush3.bf16.msra.mxu0 %v512_v11 }
  0x3a   :  { %470 = vmatprep.subr.bf16.mxu0 %v577_v0 }
  0x3b   :  { %489 = vmatpush3.bf16.msra.mxu1 %v520_v19 }
  0x3c   :  { %490 = vmatprep.subr.bf16.mxu1 %v577_v0 }
  0x3d   :  { %471 = vmatpush3.bf16.msra.mxu0 %v513_v12 }
  0x3e   :  { %472 = vmatprep.subr.bf16.mxu0 %v577_v0 }
  0x3f   :  { %491 = vmatpush3.bf16.msra.mxu1 %v521_v20 }
  0x40   :  { %492 = vmatprep.subr.bf16.mxu1 %v577_v0 }
  0x41   :  { %473 = vmatpush3.bf16.msra.mxu0 %v514_v13 }
  0x42   :  { %474 = vmatprep.subr.bf16.mxu0 %v577_v0 }
  0x43   :  { %493 = vmatpush3.bf16.msra.mxu1 %v522_v21 }
  0x44   :  { %494 = vmatprep.subr.bf16.mxu1 %v577_v0 }
  0x45   :  { %475 = vmatpush3.bf16.msra.mxu0 %v515_v14 }
  0x46   :  { %476 = vmatprep.subr.bf16.mxu0 %v577_v0 }
  0x47   :  { %495 = vmatpush3.bf16.msra.mxu1 %v523_v35 }
  0x48   :  { %496 = vmatprep.subr.bf16.mxu1 %v577_v0 }
  0x49   :  { %477 = vmatpush3.bf16.msra.mxu0 %v516_v15 }
  0x4b   :  { %497 = vmatpush3.bf16.msra.mxu1 %v524_v36 }
  0xff   :  { %v108_v22 = vpop.f32.mrb[0].mxu0  ;;  %v158_v24 = vpop.f32.mrb[0].mxu1 }
 0x100   :  { %v454_v23 = vpop.f32.mrb[1].mxu0  ;;  %v159_v26 = vadd.f32 %v158_v24, %v108_v22  ;;  %v460_v28 = vpop.f32.mrb[1].mxu1 }
 0x101   :  { %v111_v27 = vpop.f32.mrb[2].mxu0  ;;  %v161_v30 = vpop.f32.mrb[2].mxu1 }
 0x102   :  { %v455_v29 = vpop.f32.mrb[3].mxu0  ;;  %v171_v31 = vadd.f32 %v409_v25, %v159_v26  ;;  %v461_v32 = vpop.f32.mrb[3].mxu1 }
 0x104   :  { %v172_v33 = vmax.f32 %v171_v31, 0.0 }
 0x106   :  { %v173_v34 = vpack.c.bf16 %v172_v33, %v172_v33 }
 0x108   :  { %479 = vmatmul.mubr.bf16.vlgmr.msra.gmra.mrb[4].mxu0 %v173_v34 }
 0x1db   :  { %v279_v38 = vpop.f32.mrb[4].mxu0 }
 0x1dc   :  { %v280_v39 = vadd.f32 %v410_v37, %v279_v38  ;;  %v480_v40 = vpop.f32.mrb[5].mxu0 }
 0x1dd   :  { %v282_v41 = vpop.f32.mrb[6].mxu0 }
 0x1de   :  { %v285_v42 = vmax.f32 %v280_v39, 0.0  ;;  %v481_v43 = vpop.f32.mrb[7].mxu0 }
 0x1e0   :  { %v286_v44 = vpack.c.bf16 %v285_v42, %v285_v42 }
 0x1e2   :  { %499 = vmatmul.mubr.bf16.vlgmr.msra.gmra.mrb[4].mxu1 %v286_v44 }
 0x2b5   :  { %v392_v46 = vpop.f32.mrb[4].mxu1 }
 0x2b6   :  { %v393_v47 = vadd.f32 %v419_v45, %v392_v46  ;;  %v500_v48 = vpop.f32.mrb[5].mxu1 }
 0x2b7   :  { %v395_v49 = vpop.f32.mrb[6].mxu1 }
 0x2b8   :  { %399 = vst.msk [vmem:[%s754_s9] sm:$0xff] %vm398_vm4, %v393_v47  ;;  %v501_v50 = vpop.f32.mrb[7].mxu1 }
 0x2b9   :  { %404 = vsyncpa [#allocation3], 1 }
 0x2ba   :  { %405 = vsyncpa [#allocation5], 1 }

</bundles_post_ra>
